<compile_context>
chip_gen: v6e
topology: v6e:2x2x1
jax: 0.10.0
libtpu: 0.0.40
codegen_flags: <defaults>
</compile_context>

<pallas_src>
import jax
import jax.numpy as jnp
from jax import lax
from jax.experimental import pallas as pl
from jax.experimental.pallas import tpu as pltpu

EPS = 1e-5
NEG_SLOPE = 0.01  # PyTorch LeakyReLU default
LANES = 128       # TPU vreg lane width


def _batchnorm_train(h, gamma, beta):
    # BatchNorm1d, training mode: stats over the batch axis, biased variance.
    mean = jnp.mean(h, axis=0, keepdims=True)
    centered = h - mean
    var = jnp.mean(centered * centered, axis=0, keepdims=True)
    # rsqrt routes to the EUP slot (free alongside MXU/VPU work).
    return centered * lax.rsqrt(var + EPS) * gamma + beta


def _leaky_relu(h):
    return jnp.where(h >= 0, h, NEG_SLOPE * h)


def double_linear_block_kernel(
    x_ref,    # (N, in_features)          f32, resident (same block every step)
    w1_ref,   # (in_features, out_p)      W1.T, lane-padded, resident
    g1_ref,   # (1, out_p)   BN1 gamma, resident
    be1_ref,  # (1, out_p)   BN1 beta, resident
    w2_ref,   # (out_p, TILE_N)           W2.T column tile, pipelined
    g2_ref,   # (1, TILE_N)  BN2 gamma tile
    be2_ref,  # (1, TILE_N)  BN2 beta tile
    o_ref,    # (N, TILE_N)  output tile
):
    x = x_ref[...]

    # --- Linear 1 (bias cancelled by BN) + BatchNorm1d + LeakyReLU ---
    # Recomputed per column tile: cheap (in_features << out_p) and keeps grid
    # steps independent so the grid axis can be "parallel" (v7x megacore).
    w1 = w1_ref[...].astype(jnp.float32)
    h1 = jnp.dot(x, w1, preferred_element_type=jnp.float32)
    h1 = _leaky_relu(_batchnorm_train(h1, g1_ref[...], be1_ref[...]))

    # --- Linear 2 (bias cancelled by BN) + BatchNorm1d + LeakyReLU ---
    # Only a TILE_N-wide slice of the second stage lives per step, bounding
    # vreg pressure in the fused BN+LeakyReLU epilogue.
    w2 = w2_ref[...].astype(jnp.float32)
    h2 = jnp.dot(h1, w2, preferred_element_type=jnp.float32)
    h2 = _leaky_relu(_batchnorm_train(h2, g2_ref[...], be2_ref[...]))

    # Dropout(p=0.0) is the identity.
    o_ref[...] = h2.astype(o_ref.dtype)


def _pick_tile_n(out_p):
    # Lane-dense tiles; >=512 amortizes per-step overhead, 128 is the floor.
    for t in (512, 256, 128):
        if out_p % t == 0:
            return t
    return out_p  # unreachable: out_p is always a multiple of LANES


def prepare_params(params, weights_dtype=jnp.bfloat16):
    """Pad to lane-dense width and cast weights ONCE (not per forward call)."""
    in_features, out_features = params["w1"].shape
    out_p = pl.cdiv(out_features, LANES) * LANES

    def pad_last(a):
        pad = out_p - a.shape[-1]
        return a if pad == 0 else jnp.pad(a, ((0, 0), (0, pad)))

    w1 = pad_last(params["w1"]).astype(weights_dtype)
    g1 = pad_last(params["g1"])
    be1 = pad_last(params["be1"])
    w2 = pad_last(params["w2"])
    if w2.shape[0] != out_p:  # pad the contraction rows of W2 with zeros too
        w2 = jnp.pad(w2, ((0, out_p - w2.shape[0]), (0, 0)))
    w2 = w2.astype(weights_dtype)
    g2 = pad_last(params["g2"])
    be2 = pad_last(params["be2"])

    if out_p != out_features:
        # Invariant (one-time, eager check): padded gamma/beta lanes must be
        # exactly zero.  A zero-padded weight column has var=0, rsqrt(eps) is
        # huge, and only gamma=0 / beta=0 keep the padded lane at exactly 0
        # through BN + LeakyReLU and into the second matmul.
        ok = (jnp.all(g1[:, out_features:] == 0)
              & jnp.all(be1[:, out_features:] == 0)
              & jnp.all(g2[:, out_features:] == 0)
              & jnp.all(be2[:, out_features:] == 0))
        assert bool(ok), "padded gamma/beta lanes must be zero"

    return {
        "in_features": in_features, "out_features": out_features, "out_p": out_p,
        "w1": w1, "g1": g1, "be1": be1,
        "w2": w2, "g2": g2, "be2": be2,
    }


def double_linear_block(x, prep):
    """x: (N, in_features) float32. prep: output of prepare_params()."""
    n, in_features = x.shape
    assert in_features == prep["in_features"]
    out_features = prep["out_features"]
    out_p = prep["out_p"]
    tile_n = _pick_tile_n(out_p)
    steps = out_p // tile_n

    w1, g1, be1 = prep["w1"], prep["g1"], prep["be1"]
    w2, g2, be2 = prep["w2"], prep["g2"], prep["be2"]
    w_bytes = jnp.dtype(w1.dtype).itemsize

    flops = steps * 2 * n * in_features * out_p + 2 * n * out_p * out_p
    bytes_accessed = (
        x.size * 4 + w1.size * w_bytes + w2.size * w_bytes
        + (g1.size + be1.size + g2.size + be2.size) * 4 + n * out_p * 4
    )

    # Conservative VMEM budget: double-buffered pipelined operands, resident
    # layer-1 operands (budgeted x2), and headroom for the full-width h1
    # temporaries; floor 8 MiB, capped at v7x's 64 MiB physical VMEM.
    vmem_est = (
        2 * (out_p * tile_n * w_bytes)                      # W2 column tile
        + 2 * (n * tile_n + 2 * tile_n) * 4                 # out / g2 / be2 tiles
        + 2 * (n * in_features * 4 + in_features * out_p * w_bytes + 2 * out_p * 4)
        + 6 * n * out_p * 4                                 # h1 temps / spill slack
    )
    vmem_limit = int(min(max(2 * vmem_est, 8 << 20), 64 << 20))

    resident = lambda j: (0, 0)     # constant block index -> DMA'd once
    tiled_cols = lambda j: (0, j)   # column tiles of the second stage

    out = pl.pallas_call(
        double_linear_block_kernel,
        out_shape=jax.ShapeDtypeStruct((n, out_p), x.dtype),
        grid=(steps,),
        in_specs=[
            pl.BlockSpec((n, in_features), resident),       # x
            pl.BlockSpec((in_features, out_p), resident),   # W1.T
            pl.BlockSpec((1, out_p), resident),             # gamma1
            pl.BlockSpec((1, out_p), resident),             # beta1
            pl.BlockSpec((out_p, tile_n), tiled_cols),      # W2.T (pipelined)
            pl.BlockSpec((1, tile_n), tiled_cols),          # gamma2
            pl.BlockSpec((1, tile_n), tiled_cols),          # beta2
        ],
        out_specs=pl.BlockSpec((n, tile_n), tiled_cols),
        compiler_params=pltpu.CompilerParams(
            dimension_semantics=("parallel",),              # shards tiles across TCs on v7x
            vmem_limit_bytes=vmem_limit,
        ),
        cost_estimate=pl.CostEstimate(
            flops=flops,
            transcendentals=steps * (out_p + tile_n),       # one rsqrt per feature per BN
            bytes_accessed=bytes_accessed,
        ),
    )(x, w1, g1, be1, w2, g2, be2)

    return out if out_p == out_features else out[:, :out_features]


def init_params(key, in_features, out_features):
    """Deterministic synthetic parameters (PyTorch-shaped, pre-transposed)."""
    k1, k2, k3, k4, k5, k6 = jax.random.split(key, 6)
    bound1 = 1.0 / jnp.sqrt(in_features)
    bound2 = 1.0 / jnp.sqrt(out_features)
    return {
        # Linear 1: PyTorch weight is (out,in); stored transposed as (in,out).
        "w1": jax.random.uniform(k1, (in_features, out_features), jnp.float32,
                                 -bound1, bound1),
        # Biases are kept only for the reference; cancelled by training-mode BN.
        "b1": jax.random.uniform(k2, (1, out_features), jnp.float32,
                                 -bound1, bound1),
        "g1": 1.0 + 0.1 * jax.random.normal(k3, (1, out_features), jnp.float32),
        "be1": 0.1 * jax.random.normal(k4, (1, out_features), jnp.float32),
        # Linear 2
        "w2": jax.random.uniform(k5, (out_features, out_features), jnp.float32,
                                 -bound2, bound2),
        "b2": jax.random.uniform(k6, (1, out_features), jnp.float32,
                                 -bound2, bound2),
        "g2": jnp.ones((1, out_features), jnp.float32),
        "be2": jnp.zeros((1, out_features), jnp.float32),
    }


def _reference(x, p, weights_dtype=jnp.float32):
    """Pure-JAX reference *including* the Linear biases (they cancel in BN).

    weights_dtype lets us compare the bf16-weight kernel against a reference
    that uses the identical bf16-rounded weights (upcast to f32)."""
    w1 = p["w1"].astype(weights_dtype).astype(jnp.float32)
    w2 = p["w2"].astype(weights_dtype).astype(jnp.float32)
    h = jnp.dot(x, w1, precision=lax.Precision.HIGHEST) + p["b1"]
    h = _leaky_relu(_batchnorm_train(h, p["g1"], p["be1"]))
    h = jnp.dot(h, w2, precision=lax.Precision.HIGHEST) + p["b2"]
    h = _leaky_relu(_batchnorm_train(h, p["g2"], p["be2"]))
    return h


if __name__ == "__main__":
    key = jax.random.PRNGKey(0)

    def run_case(in_features, out_features, batch, weights_dtype, tol):
        kx, kp = jax.random.split(jax.random.fold_in(key, out_features))
        x = jax.random.normal(kx, (batch, in_features), jnp.float32)
        params = init_params(kp, in_features, out_features)
        prep = prepare_params(params, weights_dtype=weights_dtype)
        out = jax.block_until_ready(double_linear_block(x, prep))
        ref = _reference(x, params, weights_dtype=weights_dtype)
        assert out.shape == (batch, out_features)
        assert jnp.allclose(out, ref, atol=tol, rtol=tol), (
            f"mismatch: in={in_features} out={out_features} wdtype={weights_dtype}")

    # 1) f32 weights: exact match to the PyTorch-module semantics.
    run_case(32, 128, 8, jnp.float32, 1e-4)
    # 2) bf16 weights (halved HBM weight stream), f32 accumulation; compared
    #    against a reference built from the same bf16-rounded weights.
    run_case(32, 128, 8, jnp.bfloat16, 1e-3)
    # 3) Multi-tile grid + lane padding exercised: out=320 -> out_p=384,
    #    TILE_N=128, grid=(3,).
    run_case(32, 320, 8, jnp.bfloat16, 1e-3)

    print("KERNEL_OK")
</pallas_src>

<mosaic_0001>
module attributes {stable_mosaic.version = 11 : i64} {
  func.func @double_linear_block_kernel(%arg0: i32, %arg1: memref<8x32xf32, #tpu.memory_space<vmem>>, %arg2: memref<32x128xf32, #tpu.memory_space<vmem>>, %arg3: memref<1x128xf32, #tpu.memory_space<vmem>>, %arg4: memref<1x128xf32, #tpu.memory_space<vmem>>, %arg5: memref<128x128xf32, #tpu.memory_space<vmem>>, %arg6: memref<1x128xf32, #tpu.memory_space<vmem>>, %arg7: memref<1x128xf32, #tpu.memory_space<vmem>>, %arg8: memref<8x128xf32, #tpu.memory_space<vmem>>) attributes {dimension_semantics = [#tpu.dimension_semantics<parallel>], iteration_bounds = array<i64: 1>, scalar_prefetch = 0 : i64, scratch_operands = 0 : i64, tpu.core_type = #tpu.core_type<tc>, window_params = [{pipeline_mode = #tpu.pipeline_mode<synchronous>, transform_indices = @transform_0, window_bounds = array<i64: 8, 32>}, {pipeline_mode = #tpu.pipeline_mode<synchronous>, transform_indices = @transform_1, window_bounds = array<i64: 32, 128>}, {pipeline_mode = #tpu.pipeline_mode<synchronous>, transform_indices = @transform_2, window_bounds = array<i64: 1, 128>}, {pipeline_mode = #tpu.pipeline_mode<synchronous>, transform_indices = @transform_3, window_bounds = array<i64: 1, 128>}, {transform_indices = @transform_4, window_bounds = array<i64: 128, 128>}, {transform_indices = @transform_5, window_bounds = array<i64: 1, 128>}, {transform_indices = @transform_6, window_bounds = array<i64: 1, 128>}, {transform_indices = @transform_7, window_bounds = array<i64: 8, 128>}]} {
    %c0 = arith.constant 0 : index
    %c0_0 = arith.constant 0 : index
    %0 = vector.load %arg1[%c0, %c0_0] : memref<8x32xf32, #tpu.memory_space<vmem>>, vector<8x32xf32>
    %c0_1 = arith.constant 0 : index
    %c0_2 = arith.constant 0 : index
    %1 = vector.load %arg2[%c0_1, %c0_2] : memref<32x128xf32, #tpu.memory_space<vmem>>, vector<32x128xf32>
    %cst = arith.constant dense<0.000000e+00> : vector<8x128xf32>
    %2 = tpu.matmul %0, %1, %cst {dimension_numbers = #tpu.dot_dimension_numbers<[1], [0], [0], [1], [0, 0, 1, 1], [], []>} : vector<8x32xf32>, vector<32x128xf32>, vector<8x128xf32> -> vector<8x128xf32>
    %c0_3 = arith.constant 0 : index
    %c0_4 = arith.constant 0 : index
    %3 = vector.load %arg3[%c0_3, %c0_4] : memref<1x128xf32, #tpu.memory_space<vmem>>, vector<1x128xf32>
    %c0_5 = arith.constant 0 : index
    %c0_6 = arith.constant 0 : index
    %4 = vector.load %arg4[%c0_5, %c0_6] : memref<1x128xf32, #tpu.memory_space<vmem>>, vector<1x128xf32>
    %cst_7 = arith.constant dense<0.000000e+00> : vector<128xf32>
    %5 = vector.multi_reduction <add>, %2, %cst_7 [0] : vector<8x128xf32> to vector<128xf32>
    %6 = vector.shape_cast %5 : vector<128xf32> to vector<1x128xf32>
    %cst_8 = arith.constant 8.000000e+00 : f32
    %7 = vector.broadcast %cst_8 : f32 to vector<1x128xf32>
    %8 = arith.divf %6, %7 : vector<1x128xf32>
    %9 = vector.broadcast %8 : vector<1x128xf32> to vector<8x128xf32>
    %10 = arith.subf %2, %9 : vector<8x128xf32>
    %11 = arith.mulf %10, %10 : vector<8x128xf32>
    %cst_9 = arith.constant dense<0.000000e+00> : vector<128xf32>
    %12 = vector.multi_reduction <add>, %11, %cst_9 [0] : vector<8x128xf32> to vector<128xf32>
    %13 = vector.shape_cast %12 : vector<128xf32> to vector<1x128xf32>
    %cst_10 = arith.constant 8.000000e+00 : f32
    %14 = vector.broadcast %cst_10 : f32 to vector<1x128xf32>
    %15 = arith.divf %13, %14 : vector<1x128xf32>
    %cst_11 = arith.constant 9.99999974E-6 : f32
    %16 = vector.broadcast %cst_11 : f32 to vector<1x128xf32>
    %17 = arith.addf %15, %16 : vector<1x128xf32>
    %18 = math.rsqrt %17 : vector<1x128xf32>
    %19 = vector.broadcast %18 : vector<1x128xf32> to vector<8x128xf32>
    %20 = arith.mulf %10, %19 : vector<8x128xf32>
    %21 = vector.broadcast %3 : vector<1x128xf32> to vector<8x128xf32>
    %22 = arith.mulf %20, %21 : vector<8x128xf32>
    %23 = vector.broadcast %4 : vector<1x128xf32> to vector<8x128xf32>
    %24 = arith.addf %22, %23 : vector<8x128xf32>
    %cst_12 = arith.constant 0.000000e+00 : f32
    %25 = vector.broadcast %cst_12 : f32 to vector<8x128xf32>
    %26 = arith.cmpf oge, %24, %25 : vector<8x128xf32>
    %cst_13 = arith.constant 0.00999999977 : f32
    %27 = vector.broadcast %cst_13 : f32 to vector<8x128xf32>
    %28 = arith.mulf %27, %24 : vector<8x128xf32>
    %29 = arith.select %26, %24, %28 : vector<8x128xi1>, vector<8x128xf32>
    %c0_14 = arith.constant 0 : index
    %c0_15 = arith.constant 0 : index
    %30 = vector.load %arg5[%c0_14, %c0_15] : memref<128x128xf32, #tpu.memory_space<vmem>>, vector<128x128xf32>
    %cst_16 = arith.constant dense<0.000000e+00> : vector<8x128xf32>
    %31 = tpu.matmul %29, %30, %cst_16 {dimension_numbers = #tpu.dot_dimension_numbers<[1], [0], [0], [1], [0, 0, 1, 1], [], []>} : vector<8x128xf32>, vector<128x128xf32>, vector<8x128xf32> -> vector<8x128xf32>
    %c0_17 = arith.constant 0 : index
    %c0_18 = arith.constant 0 : index
    %32 = vector.load %arg6[%c0_17, %c0_18] : memref<1x128xf32, #tpu.memory_space<vmem>>, vector<1x128xf32>
    %c0_19 = arith.constant 0 : index
    %c0_20 = arith.constant 0 : index
    %33 = vector.load %arg7[%c0_19, %c0_20] : memref<1x128xf32, #tpu.memory_space<vmem>>, vector<1x128xf32>
    %cst_21 = arith.constant dense<0.000000e+00> : vector<128xf32>
    %34 = vector.multi_reduction <add>, %31, %cst_21 [0] : vector<8x128xf32> to vector<128xf32>
    %35 = vector.shape_cast %34 : vector<128xf32> to vector<1x128xf32>
    %cst_22 = arith.constant 8.000000e+00 : f32
    %36 = vector.broadcast %cst_22 : f32 to vector<1x128xf32>
    %37 = arith.divf %35, %36 : vector<1x128xf32>
    %38 = vector.broadcast %37 : vector<1x128xf32> to vector<8x128xf32>
    %39 = arith.subf %31, %38 : vector<8x128xf32>
    %40 = arith.mulf %39, %39 : vector<8x128xf32>
    %cst_23 = arith.constant dense<0.000000e+00> : vector<128xf32>
    %41 = vector.multi_reduction <add>, %40, %cst_23 [0] : vector<8x128xf32> to vector<128xf32>
    %42 = vector.shape_cast %41 : vector<128xf32> to vector<1x128xf32>
    %cst_24 = arith.constant 8.000000e+00 : f32
    %43 = vector.broadcast %cst_24 : f32 to vector<1x128xf32>
    %44 = arith.divf %42, %43 : vector<1x128xf32>
    %cst_25 = arith.constant 9.99999974E-6 : f32
    %45 = vector.broadcast %cst_25 : f32 to vector<1x128xf32>
    %46 = arith.addf %44, %45 : vector<1x128xf32>
    %47 = math.rsqrt %46 : vector<1x128xf32>
    %48 = vector.broadcast %47 : vector<1x128xf32> to vector<8x128xf32>
    %49 = arith.mulf %39, %48 : vector<8x128xf32>
    %50 = vector.broadcast %32 : vector<1x128xf32> to vector<8x128xf32>
    %51 = arith.mulf %49, %50 : vector<8x128xf32>
    %52 = vector.broadcast %33 : vector<1x128xf32> to vector<8x128xf32>
    %53 = arith.addf %51, %52 : vector<8x128xf32>
    %cst_26 = arith.constant 0.000000e+00 : f32
    %54 = vector.broadcast %cst_26 : f32 to vector<8x128xf32>
    %55 = arith.cmpf oge, %53, %54 : vector<8x128xf32>
    %cst_27 = arith.constant 0.00999999977 : f32
    %56 = vector.broadcast %cst_27 : f32 to vector<8x128xf32>
    %57 = arith.mulf %56, %53 : vector<8x128xf32>
    %58 = arith.select %55, %53, %57 : vector<8x128xi1>, vector<8x128xf32>
    %c0_28 = arith.constant 0 : index
    %c0_29 = arith.constant 0 : index
    %59 = vector.load %arg8[%c0_28, %c0_29] : memref<8x128xf32, #tpu.memory_space<vmem>>, vector<8x128xf32>
    tpu.vector_store %arg8[%c0_28, %c0_29], %58 {strides = array<i32>} : memref<8x128xf32, #tpu.memory_space<vmem>>, vector<8x128xf32>,
    return
  }
  func.func @transform_0(%arg0: i32) -> (i32, i32) {
    %c0_i32 = arith.constant 0 : i32
    %c0_i32_0 = arith.constant 0 : i32
    %c0_i32_1 = arith.constant 0 : i32
    return %c0_i32, %c0_i32_0 : i32, i32
  }
  func.func @transform_1(%arg0: i32) -> (i32, i32) {
    %c0_i32 = arith.constant 0 : i32
    %c0_i32_0 = arith.constant 0 : i32
    %c0_i32_1 = arith.constant 0 : i32
    return %c0_i32, %c0_i32_0 : i32, i32
  }
  func.func @transform_2(%arg0: i32) -> (i32, i32) {
    %c0_i32 = arith.constant 0 : i32
    %c0_i32_0 = arith.constant 0 : i32
    %c0_i32_1 = arith.constant 0 : i32
    return %c0_i32, %c0_i32_0 : i32, i32
  }
  func.func @transform_3(%arg0: i32) -> (i32, i32) {
    %c0_i32 = arith.constant 0 : i32
    %c0_i32_0 = arith.constant 0 : i32
    %c0_i32_1 = arith.constant 0 : i32
    return %c0_i32, %c0_i32_0 : i32, i32
  }
  func.func @transform_4(%arg0: i32) -> (i32, i32) {
    %c0_i32 = arith.constant 0 : i32
    %c0_i32_0 = arith.constant 0 : i32
    return %c0_i32, %arg0 : i32, i32
  }
  func.func @transform_5(%arg0: i32) -> (i32, i32) {
    %c0_i32 = arith.constant 0 : i32
    %c0_i32_0 = arith.constant 0 : i32
    return %c0_i32, %arg0 : i32, i32
  }
  func.func @transform_6(%arg0: i32) -> (i32, i32) {
    %c0_i32 = arith.constant 0 : i32
    %c0_i32_0 = arith.constant 0 : i32
    return %c0_i32, %arg0 : i32, i32
  }
  func.func @transform_7(%arg0: i32) -> (i32, i32) {
    %c0_i32 = arith.constant 0 : i32
    %c0_i32_0 = arith.constant 0 : i32
    return %c0_i32, %arg0 : i32, i32
  }
}

</mosaic_0001>

<bundles_post_ra>
// kernel: tpu_custom_call.1
= control target key start
LH: loop header
LB: loop body
LE: loop exit
PB: predicated region body
PF: predicated region fallthrough
CT: control target
= control target key end

     0   :  { %12 = vsyncpa [#allocation3], 0  ;;  %s590_s0 = inlined_call_operand.hbm [shape: f32[8,32], index: 0, kind: input, shape index: {}]   ;;  %s591_s1 = inlined_call_operand.hbm [shape: f32[32,128], index: 1, kind: input, shape index: {}]   ;;  %s592_s2 = inlined_call_operand.vmem [shape: f32[1,128], index: 2, kind: input, shape index: {}]   ;;  %s593_s3 = inlined_call_operand.vmem [shape: f32[1,128], index: 3, kind: input, shape index: {}]   ;;  %s594_s4 = inlined_call_operand.hbm [shape: f32[128,128], index: 4, kind: input, shape index: {}]   ;;  %s595_s5 = inlined_call_operand.vmem [shape: f32[1,128], index: 5, kind: input, shape index: {}]   ;;  %s596_s6 = inlined_call_operand.vmem [shape: f32[1,128], index: 6, kind: input, shape index: {}]   ;;  %s597_s7 = inlined_call_operand.hbm [shape: f32[8,128], index: 7, kind: output, shape index: {}]  }
   0x1   :  { %13 = vsyncpa [#allocation6], 0 }
   0x2   :  { %14 = vsyncpa [#allocation4], 0  ;;  %s496_s24 = smov [#allocation5]  }
   0x3   :  { %s30_s25 = sshll.u32 %s496_s24, 4  ;;  %s31_s25 = int_to_ptr.vmem [resolvable:$true] %s30_s25 }
   0x4   :  { %s418_s26 = scalar_lea.vmem %s31_s25, 512  ;;  %p423_p1 = scmp.lt.s32.totalorder %s31_s25, %s31_s25 }
   0x5   :  { %p419_p0 = scmp.ne.s32.totalorder %s31_s25, %s418_s26  ;;  %p424_p2 = scmp.lt.s32.totalorder %s418_s26, %s418_s26 }
   0x7   :  { %p425_p3 = por %p424_p2, %p423_p1 }
   0x9   :  { %p426_p4 = pnand %p425_p3, %p419_p0 }
   0xb   :  { %429 = shalt.err (!%p426_p4)
}
   0xc   :  { %s497_s27 = smov 128   ;;  %s498_s28 = smov 8  }
   0xd   :  { %36 = dma.hbm_to_vmem [thread:$0]  %s591_s1, 512, %s31_s25, [#allocation6], %s497_s27, %s497_s27, %s498_s28  }
   0xe   :  { %s499_s8 = smov [#allocation2]   ;;  %s500_s10 = smov [#allocation7]  }
   0xf   :  { %s21_s9 = sshll.u32 %s499_s8, 4  ;;  %s46_s11 = sshll.u32 %s500_s10, 4  ;;  %s22_s9 = int_to_ptr.vmem [resolvable:$true] %s21_s9  ;;  %s47_s11 = int_to_ptr.vmem [resolvable:$true] %s46_s11 }
  0x10   :  { %s438_s12 = scalar_lea.vmem %s22_s9, 128  ;;  %p443_p6 = scmp.lt.s32.totalorder %s22_s9, %s22_s9 }
  0x11   :  { %p439_p5 = scmp.ne.s32.totalorder %s22_s9, %s438_s12  ;;  %p444_p7 = scmp.lt.s32.totalorder %s438_s12, %s438_s12 }
  0x13   :  { %p445_p8 = por %p444_p7, %p443_p6 }
  0x15   :  { %p446_p9 = pnand %p445_p8, %p439_p5 }
  0x17   :  { %449 = shalt.err (!%p446_p9)
}
  0x18   :  { %24 = dma.hbm_to_vmem [thread:$0]  %s590_s0, 128, %s22_s9, [#allocation3]  }
  0x19   :  { %s458_s15 = scalar_lea.vmem %s47_s11, 2048  ;;  %p463_p11 = scmp.lt.s32.totalorder %s47_s11, %s47_s11 }
  0x1a   :  { %p459_p10 = scmp.ne.s32.totalorder %s47_s11, %s458_s15  ;;  %p464_p12 = scmp.lt.s32.totalorder %s458_s15, %s458_s15 }
  0x1c   :  { %p465_p13 = por %p464_p12, %p463_p11 }
  0x1e   :  { %p466_p0 = pnand %p465_p13, %p459_p10 }
  0x20   :  { %469 = shalt.err (!%p466_p0)
}
  0x21   :  { %52 = dma.hbm_to_vmem [thread:$0]  %s594_s4, 2048, %s47_s11, [#allocation6], %s497_s27, %s497_s27, %s498_s28  }
  0x22   :  { %490 = dma.done.wait [#allocation3], 128  }
  0x23   :  { %491 = vsyncadd [#allocation3], 4294967168 }
  0x24   :  { %492 = dma.done.wait [#allocation6], 2560  }
  0x25   :  { %493 = vsyncadd [#allocation6], 4294964736  ;;  %v501_v0 = vmov 0.0   ;;  %vm502_vm0 = vmmov 0   ;;  %v70_v1 = vld [vmem:[#allocation5 + $0x18] sm:$0xff]  ;;  %v69_v2 = vld [vmem:[#allocation5 + $0x10] sm:$0xff] }
  0x26   :  { %352 = vmatprep.subr.mxu0 %v501_v0  ;;  %360 = vmatprep.mubr.msk.f32.mxu0 %vm502_vm0, %v501_v0  ;;  %v68_v3 = vld [vmem:[#allocation5 + $0x8] sm:$0xff]  ;;  %v67_v4 = vld [vmem:[#allocation5] sm:$0xff]  ;;  %v66_v5 = vld [vmem:[#allocation2] sm:$0xff]  ;;  %vm71_vm1 = vcmask 261120   ;;  %s503_s21 = smov [#allocation8]  }
  0x27   :  { %363 = vmatprep.subr.mxu1 %v501_v0  ;;  %395 = vmatprep.mubr.msk.f32.mxu1 %vm502_vm0, %v501_v0  ;;  %v199_v6 = vld [vmem:[#allocation7 + $0x78] sm:$0xff]  ;;  %v198_v7 = vld [vmem:[#allocation7 + $0x70] sm:$0xff]  ;;  %v197_v8 = vld [vmem:[#allocation7 + $0x68] sm:$0xff]  ;;  %s315_s22 = sshll.u32 %s503_s21, 4  ;;  %s316_s22 = int_to_ptr.vmem [resolvable:$true] %s315_s22 }
  0x28   :  { %353 = vmatpush3.msra.mxu0 %v70_v1  ;;  %364 = vmatpush3.msra.mxu1 %v199_v6  ;;  %v196_v9 = vld [vmem:[#allocation7 + $0x60] sm:$0xff]  ;;  %v195_v10 = vld [vmem:[#allocation7 + $0x58] sm:$0xff]  ;;  %v194_v11 = vld [vmem:[#allocation7 + $0x50] sm:$0xff]  ;;  %s470_s23 = scalar_lea.vmem %s316_s22, 128  ;;  %p475_p2 = scmp.lt.s32.totalorder %s316_s22, %s316_s22 }
  0x29   :  { %354 = vmatprep.subr.mxu0 %v501_v0  ;;  %365 = vmatprep.subr.mxu1 %v501_v0  ;;  %v193_v12 = vld [vmem:[#allocation7 + $0x48] sm:$0xff]  ;;  %v192_v13 = vld [vmem:[#allocation7 + $0x40] sm:$0xff]  ;;  %v191_v14 = vld [vmem:[#allocation7 + $0x38] sm:$0xff]  ;;  %p471_p1 = scmp.ne.s32.totalorder %s316_s22, %s470_s23  ;;  %p476_p3 = scmp.lt.s32.totalorder %s470_s23, %s470_s23 }
  0x2a   :  { %355 = vmatpush3.msra.mxu0 %v69_v2  ;;  %366 = vmatpush3.msra.mxu1 %v198_v7  ;;  %v190_v15 = vld [vmem:[#allocation7 + $0x30] sm:$0xff]  ;;  %v189_v16 = vld [vmem:[#allocation7 + $0x28] sm:$0xff]  ;;  %v188_v17 = vld [vmem:[#allocation7 + $0x20] sm:$0xff] }
  0x2b   :  { %356 = vmatprep.subr.mxu0 %v501_v0  ;;  %367 = vmatprep.subr.mxu1 %v501_v0  ;;  %v187_v18 = vld [vmem:[#allocation7 + $0x18] sm:$0xff]  ;;  %v186_v19 = vld [vmem:[#allocation7 + $0x10] sm:$0xff]  ;;  %v185_v20 = vld [vmem:[#allocation7 + $0x8] sm:$0xff]  ;;  %p477_p4 = por %p476_p3, %p475_p2 }
  0x2c   :  { %357 = vmatpush3.msra.mxu0 %v68_v3  ;;  %368 = vmatpush3.msra.mxu1 %v197_v8  ;;  %v184_v21 = vld [vmem:[#allocation7] sm:$0xff]  ;;  %v326_v42 = vld [vmem:[%s592_s2] ss:$0 sm:$0xff] }
  0x2d   :  { %358 = vmatprep.subr.mxu0 %v501_v0  ;;  %369 = vmatprep.subr.mxu1 %v501_v0  ;;  %v327_v44 = vld [vmem:[%s593_s3] ss:$0 sm:$0xff]  ;;  %p478_p5 = pnand %p477_p4, %p471_p1 }
  0x2e   :  { %359 = vmatpush3.msra.mxu0 %v67_v4  ;;  %370 = vmatpush3.msra.mxu1 %v196_v9  ;;  %v329_v7 = vld [vmem:[%s596_s6] ss:$0 sm:$0xff] }
  0x2f   :  { %361 = vmatmul.mubr.msk.f32.vlgmr.msra.gmra.mxu0 %vm71_vm1, %v66_v5  ;;  %371 = vmatprep.subr.mxu1 %v501_v0  ;;  %v328_v5 = vld [vmem:[%s595_s5] ss:$0 sm:$0xff] }
  0x30   :  { %372 = vmatpush3.msra.mxu1 %v195_v10 }
  0x31   :  { %373 = vmatprep.subr.mxu1 %v501_v0 }
  0x32   :  { %374 = vmatpush3.msra.mxu1 %v194_v11 }
  0x33   :  { %375 = vmatprep.subr.mxu1 %v501_v0 }
  0x34   :  { %376 = vmatpush3.msra.mxu1 %v193_v12 }
  0x35   :  { %377 = vmatprep.subr.mxu1 %v501_v0 }
  0x36   :  { %378 = vmatpush3.msra.mxu1 %v192_v13 }
  0x37   :  { %379 = vmatprep.subr.mxu1 %v501_v0 }
  0x38   :  { %380 = vmatpush3.msra.mxu1 %v191_v14 }
  0x39   :  { %381 = vmatprep.subr.mxu1 %v501_v0 }
  0x3a   :  { %382 = vmatpush3.msra.mxu1 %v190_v15 }
  0x3b   :  { %383 = vmatprep.subr.mxu1 %v501_v0 }
  0x3c   :  { %384 = vmatpush3.msra.mxu1 %v189_v16 }
  0x3d   :  { %385 = vmatprep.subr.mxu1 %v501_v0 }
  0x3e   :  { %386 = vmatpush3.msra.mxu1 %v188_v17 }
  0x3f   :  { %387 = vmatprep.subr.mxu1 %v501_v0 }
  0x40   :  { %388 = vmatpush3.msra.mxu1 %v187_v18 }
  0x41   :  { %389 = vmatprep.subr.mxu1 %v501_v0 }
  0x42   :  { %390 = vmatpush3.msra.mxu1 %v186_v19 }
  0x43   :  { %391 = vmatprep.subr.mxu1 %v501_v0 }
  0x44   :  { %392 = vmatpush3.msra.mxu1 %v185_v20 }
  0x45   :  { %393 = vmatprep.subr.mxu1 %v501_v0 }
  0x46   :  { %394 = vmatpush3.msra.mxu1 %v184_v21 }
  0xef   :  { %v141_v22 = vpop.f32.mrf.mxu0 }
  0xf0   :  { %v147_v23 = vrot.slane %v141_v22, 4 }
  0xf1   :  { %v362_v24 = vpop.f32.mrf.mxu0 }
  0xf2   :  { %v148_v25 = vadd.f32 %v147_v23, %v141_v22 }
  0xf4   :  { %v149_v26 = vrot.slane %v148_v25, 2 }
  0xf6   :  { %v150_v27 = vadd.f32 %v149_v26, %v148_v25 }
  0xf8   :  { %v151_v28 = vrot.slane %v150_v27, 1 }
  0xfa   :  { %v152_v29 = vadd.f32 %v151_v28, %v150_v27 }
  0xfc   :  { %v154_v30 = vmul.f32 0.125, %v152_v29 }
  0xfe   :  { %v155_v31 = vsub.f32 %v141_v22, %v154_v30 }
 0x100   :  { %v156_v32 = vmul.f32 %v155_v31, %v155_v31 }
 0x102   :  { %v157_v33 = vrot.slane %v156_v32, 4 }
 0x104   :  { %v158_v34 = vadd.f32 %v157_v33, %v156_v32 }
 0x106   :  { %v159_v35 = vrot.slane %v158_v34, 2 }
 0x108   :  { %v160_v36 = vadd.f32 %v159_v35, %v158_v34 }
 0x10a   :  { %v161_v37 = vrot.slane %v160_v36, 1 }
 0x10c   :  { %v162_v38 = vadd.f32 %v161_v37, %v160_v36 }
 0x10e   :  { %v163_v39 = vmul.f32 0.125, %v162_v38 }
 0x110   :  { %v164_v40 = vadd.f32 1e-05, %v163_v39 }
 0x112   :  { %406 = vrsqrt.f32 %v164_v40 }
 0x11f   :  { %v407_v41 = vpop.eup %406 }
 0x120   :  { %v166_v43 = vmul.f32 %v407_v41, %v155_v31 }
 0x122   :  { %v173_v45 = vmul.f32 %v326_v42, %v166_v43 }
 0x124   :  { %v180_v46 = vadd.f32 %v327_v44, %v173_v45 }
 0x126   :  { %vm181_vm2 = vcmp.ge.f32.partialorder %v180_v46, 0.0  ;;  %v182_v47 = vmul.f32 0.01, %v180_v46 }
 0x128   :  { %v183_v48 = vsel %vm181_vm2, %v180_v46, %v182_v47 }
 0x129   :  { %396 = vmatmul.mubr.f32.vlgmr.msra.gmra.mxu1 %v183_v48 }
 0x1e9   :  { %v266_v49 = vpop.f32.mrf.mxu1 }
 0x1ea   :  { %v272_v50 = vrot.slane %v266_v49, 4 }
 0x1eb   :  { %v397_v51 = vpop.f32.mrf.mxu1 }
 0x1ec   :  { %v273_v52 = vadd.f32 %v272_v50, %v266_v49 }
 0x1ee   :  { %v274_v53 = vrot.slane %v273_v52, 2 }
 0x1f0   :  { %v275_v54 = vadd.f32 %v274_v53, %v273_v52 }
 0x1f2   :  { %v276_v55 = vrot.slane %v275_v54, 1 }
 0x1f4   :  { %v277_v56 = vadd.f32 %v276_v55, %v275_v54 }
 0x1f6   :  { %v278_v57 = vmul.f32 0.125, %v277_v56 }
 0x1f8   :  { %v279_v58 = vsub.f32 %v266_v49, %v278_v57 }
 0x1fa   :  { %v280_v59 = vmul.f32 %v279_v58, %v279_v58 }
 0x1fc   :  { %v281_v60 = vrot.slane %v280_v59, 4 }
 0x1fe   :  { %v282_v61 = vadd.f32 %v281_v60, %v280_v59 }
 0x200   :  { %v283_v62 = vrot.slane %v282_v61, 2 }
 0x202   :  { %v284_v63 = vadd.f32 %v283_v62, %v282_v61 }
 0x204   :  { %v285_v0 = vrot.slane %v284_v63, 1 }
 0x206   :  { %v286_v1 = vadd.f32 %v285_v0, %v284_v63 }
 0x208   :  { %v287_v2 = vmul.f32 0.125, %v286_v1 }
 0x20a   :  { %v288_v3 = vadd.f32 1e-05, %v287_v2 }
 0x20c   :  { %408 = vrsqrt.f32 %v288_v3 }
 0x219   :  { %v409_v4 = vpop.eup %408 }
 0x21a   :  { %v290_v6 = vmul.f32 %v409_v4, %v279_v58 }
 0x21c   :  { %v297_v8 = vmul.f32 %v328_v5, %v290_v6 }
 0x21e   :  { %v304_v9 = vadd.f32 %v329_v7, %v297_v8 }
 0x220   :  { %vm305_vm3 = vcmp.ge.f32.partialorder %v304_v9, 0.0  ;;  %v306_v10 = vmul.f32 0.01, %v304_v9 }
 0x222   :  { %v307_v11 = vsel %vm305_vm3, %v304_v9, %v306_v10 }
 0x223   :  { %308 = vst [vmem:[#allocation8] sm:$0xff] %v307_v11 }
 0x224   :  { %481 = shalt.err (!%p478_p5)
}
 0x225   :  { %318 = dma.vmem_to_hbm [thread:$0]  %s316_s22, 128, %s597_s7, [#allocation4]  }
 0x226   :  { %494 = dma.done.wait [#allocation4], 128  }
 0x227   :  { %495 = vsyncadd [#allocation4], 4294967168 }
 0x228   :  { %322 = vsyncpa [#allocation3], 1 }
 0x229   :  { %323 = vsyncpa [#allocation6], 1 }
 0x22a   :  { %324 = vsyncpa [#allocation4], 1 }

</bundles_post_ra>
